<compile_context>
chip_gen: v7x
topology: tpu7x:2x2x1
jax: 0.10.0
libtpu: 0.0.40
codegen_flags: <defaults>
</compile_context>

<pallas_src>
import functools

import jax
import jax.numpy as jnp
from jax.experimental import pallas as pl
from jax.experimental.pallas import tpu as pltpu

N_CHANNELS = 32          # C
N_HEADS = 4
HEAD_SIZE = N_CHANNELS // N_HEADS   # H = 8  (n_heads * head_size == n_channels, required by linlay)
SEQ_LEN = 8              # T
BATCH = 2                # B


def mha_kernel(x_ref, wqkv_ref, bqkv_ref, wo_ref, bo_ref, o_ref, *, B, T, nH, H):
    """Fused multi-head attention + output projection for the whole batch."""
    C = nH * H
    scale = C ** (-0.5)                    # torch: * C ** (-0.5), C = n_channels

    x = x_ref[...]                                                    # [B*T, C]

    # One fused Q/K/V projection for every batch row and every head.
    qkv = (jnp.dot(x, wqkv_ref[...], preferred_element_type=jnp.float32)
           + bqkv_ref[...])                                           # [B*T, 3C]

    # Raw attention scores for every (batch, head), stacked along sublanes so the
    # softmax epilogue below is issued exactly once for all of them.
    scores = []
    values = []
    for b in range(B):
        r0 = b * T
        for h in range(nH):
            c0 = h * H
            q = qkv[r0:r0 + T, c0:c0 + H]                             # [T, H]
            k = qkv[r0:r0 + T, C + c0:C + c0 + H]                     # [T, H]
            values.append(qkv[r0:r0 + T, 2 * C + c0:2 * C + c0 + H])  # [T, H]
            scores.append(jax.lax.dot_general(                        # q @ k^T, no transpose op
                q, k, (((1,), (1,)), ((), ())),
                preferred_element_type=jnp.float32))                  # [T, T]
    s = jnp.concatenate(scores, axis=0) * scale                       # [B*nH*T, T]

    # Numerically-stable softmax over keys; one instruction stream for all heads,
    # reciprocal on the (otherwise idle) EUP slot.
    s = s - jnp.max(s, axis=-1, keepdims=True)
    p = jnp.exp(s)
    p = p * pl.reciprocal(jnp.sum(p, axis=-1, keepdims=True), approx=True)

    # Weighted values per (batch, head), re-assembled into the torch concat layout.
    row_blocks = []
    for b in range(B):
        col_blocks = []
        for h in range(nH):
            i = b * nH + h
            p_bh = p[i * T:(i + 1) * T, :]                            # [T, T]
            col_blocks.append(jnp.dot(p_bh, values[i],
                                      preferred_element_type=jnp.float32))  # [T, H]
        row_blocks.append(jnp.concatenate(col_blocks, axis=-1))       # [T, C]
    inter = jnp.concatenate(row_blocks, axis=0)                       # [B*T, C]

    # Single output projection for all rows / heads:
    #   concat_h(out_h) @ Wo  with Wo = linlay weight stored [in, out].
    out = (jnp.dot(inter, wo_ref[...], preferred_element_type=jnp.float32)
           + bo_ref[...])                                             # [B*T, C]
    o_ref[...] = out.astype(o_ref.dtype)


@jax.jit
def multihead_forward(x, params):
    """x: [B, T, C] float32 -> [B, T, C] float32."""
    wq, bq, wk, bk, wv, bv, wo, bo = params
    B, T, C = x.shape
    nH, _, H = wq.shape

    # Fuse per-head Linear weights into the kernel layout (plain JAX, folded under jit).
    to_cols = lambda w: jnp.transpose(w, (1, 0, 2)).reshape(C, nH * H)       # [C, C]
    wqkv = jnp.concatenate([to_cols(wq), to_cols(wk), to_cols(wv)], axis=1)  # [C, 3C]
    bqkv = jnp.concatenate([bq.reshape(1, nH * H), bk.reshape(1, nH * H),
                            bv.reshape(1, nH * H)], axis=1)                  # [1, 3C]
    wo_full = wo.reshape(C, C)                                               # [C, C]

    x_flat = x.reshape(B * T, C)                                             # fold B into M

    flops = (2 * B * T * C * 3 * C            # fused QKV projection
             + B * nH * 4 * T * T * H         # scores + weighted values
             + 2 * B * T * C * C)             # output projection
    bytes_accessed = 4 * (2 * x.size + wqkv.size + bqkv.size + wo_full.size + bo.size)
    cost = pl.CostEstimate(flops=int(flops),
                           transcendentals=int(B * nH * T * (T + 1)),
                           bytes_accessed=int(bytes_accessed))

    out_flat = pl.pallas_call(
        functools.partial(mha_kernel, B=B, T=T, nH=nH, H=H),
        out_shape=jax.ShapeDtypeStruct((B * T, C), x.dtype),
        in_specs=[pl.BlockSpec(memory_space=pltpu.MemorySpace.VMEM)] * 5,
        out_specs=pl.BlockSpec(memory_space=pltpu.MemorySpace.VMEM),
        cost_estimate=cost,
    )(x_flat, wqkv, bqkv, wo_full, bo)
    return out_flat.reshape(B, T, C)


def init_params(key):
    """Deterministic init matching nn.Linear shapes (stored as [in, out])."""
    ks = jax.random.split(key, 8)
    bound = 1.0 / jnp.sqrt(N_CHANNELS)     # in_features = n_channels for every Linear
    u = lambda k, shape: jax.random.uniform(k, shape, jnp.float32, -bound, bound)
    wq = u(ks[0], (N_HEADS, N_CHANNELS, HEAD_SIZE))
    bq = u(ks[1], (N_HEADS, 1, HEAD_SIZE))
    wk = u(ks[2], (N_HEADS, N_CHANNELS, HEAD_SIZE))
    bk = u(ks[3], (N_HEADS, 1, HEAD_SIZE))
    wv = u(ks[4], (N_HEADS, N_CHANNELS, HEAD_SIZE))
    bv = u(ks[5], (N_HEADS, 1, HEAD_SIZE))
    wo = u(ks[6], (N_HEADS, HEAD_SIZE, N_CHANNELS))   # == linlay weight [C, C] split by head rows
    bo = u(ks[7], (1, N_CHANNELS))
    return wq, bq, wk, bk, wv, bv, wo, bo


def reference(x, params):
    """Pure-JAX reference of the torch forward."""
    wq, bq, wk, bk, wv, bv, wo, bo = params
    B, T, C = x.shape
    heads = []
    for h in range(N_HEADS):
        q = x @ wq[h] + bq[h]
        k = x @ wk[h] + bk[h]
        v = x @ wv[h] + bv[h]
        wei = jax.nn.softmax((q @ jnp.swapaxes(k, -1, -2)) * C ** (-0.5), axis=-1)
        heads.append(wei @ v)
    inter = jnp.concatenate(heads, axis=-1)            # [B, T, C]
    return inter @ wo.reshape(C, C) + bo


if __name__ == "__main__":
    key = jax.random.PRNGKey(0)
    kx, kp = jax.random.split(key)

    x = jax.random.normal(kx, (BATCH, SEQ_LEN, N_CHANNELS), jnp.float32)
    params = init_params(kp)

    out = jax.block_until_ready(multihead_forward(x, params))

    ref = reference(x, params)
    assert out.shape == (BATCH, SEQ_LEN, N_CHANNELS)
    # Tolerance slightly loosened vs 1e-4 because the softmax denominator uses the
    # EUP approximate reciprocal (per perf review); structure is otherwise exact f32.
    assert jnp.allclose(out, ref, atol=1e-3, rtol=1e-3), float(jnp.max(jnp.abs(out - ref)))

    print("KERNEL_OK")
</pallas_src>

<mosaic_0001>
module attributes {stable_mosaic.version = 11 : i64} {
  func.func @mha_kernel(%arg0: memref<16x32xf32, #tpu.memory_space<vmem>>, %arg1: memref<32x96xf32, #tpu.memory_space<vmem>>, %arg2: memref<1x96xf32, #tpu.memory_space<vmem>>, %arg3: memref<32x32xf32, #tpu.memory_space<vmem>>, %arg4: memref<1x32xf32, #tpu.memory_space<vmem>>, %arg5: memref<16x32xf32, #tpu.memory_space<vmem>>) attributes {dimension_semantics = [], scalar_prefetch = 0 : i64, scratch_operands = 0 : i64, tpu.core_type = #tpu.core_type<tc>} {
    %c0 = arith.constant 0 : index
    %c0_0 = arith.constant 0 : index
    %0 = vector.load %arg0[%c0, %c0_0] : memref<16x32xf32, #tpu.memory_space<vmem>>, vector<16x32xf32>
    %c0_1 = arith.constant 0 : index
    %c0_2 = arith.constant 0 : index
    %1 = vector.load %arg1[%c0_1, %c0_2] : memref<32x96xf32, #tpu.memory_space<vmem>>, vector<32x96xf32>
    %cst = arith.constant dense<0.000000e+00> : vector<16x96xf32>
    %2 = tpu.matmul %0, %1, %cst {dimension_numbers = #tpu.dot_dimension_numbers<[1], [0], [0], [1], [0, 0, 1, 1], [], []>} : vector<16x32xf32>, vector<32x96xf32>, vector<16x96xf32> -> vector<16x96xf32>
    %c0_3 = arith.constant 0 : index
    %c0_4 = arith.constant 0 : index
    %3 = vector.load %arg2[%c0_3, %c0_4] : memref<1x96xf32, #tpu.memory_space<vmem>>, vector<1x96xf32>
    %4 = vector.broadcast %3 : vector<1x96xf32> to vector<16x96xf32>
    %5 = arith.addf %2, %4 : vector<16x96xf32>
    %6 = vector.extract_strided_slice %5 {offsets = [0, 0], sizes = [8, 8], strides = [1, 1]} : vector<16x96xf32> to vector<8x8xf32>
    %7 = vector.extract_strided_slice %5 {offsets = [0, 32], sizes = [8, 8], strides = [1, 1]} : vector<16x96xf32> to vector<8x8xf32>
    %8 = vector.extract_strided_slice %5 {offsets = [0, 64], sizes = [8, 8], strides = [1, 1]} : vector<16x96xf32> to vector<8x8xf32>
    %cst_5 = arith.constant dense<0.000000e+00> : vector<8x8xf32>
    %9 = tpu.matmul %6, %7, %cst_5 {dimension_numbers = #tpu.dot_dimension_numbers<[1], [1], [0], [0], [0, 0, 1, 0], [], []>} : vector<8x8xf32>, vector<8x8xf32>, vector<8x8xf32> -> vector<8x8xf32>
    %10 = vector.extract_strided_slice %5 {offsets = [0, 8], sizes = [8, 8], strides = [1, 1]} : vector<16x96xf32> to vector<8x8xf32>
    %11 = vector.extract_strided_slice %5 {offsets = [0, 40], sizes = [8, 8], strides = [1, 1]} : vector<16x96xf32> to vector<8x8xf32>
    %12 = vector.extract_strided_slice %5 {offsets = [0, 72], sizes = [8, 8], strides = [1, 1]} : vector<16x96xf32> to vector<8x8xf32>
    %cst_6 = arith.constant dense<0.000000e+00> : vector<8x8xf32>
    %13 = tpu.matmul %10, %11, %cst_6 {dimension_numbers = #tpu.dot_dimension_numbers<[1], [1], [0], [0], [0, 0, 1, 0], [], []>} : vector<8x8xf32>, vector<8x8xf32>, vector<8x8xf32> -> vector<8x8xf32>
    %14 = vector.extract_strided_slice %5 {offsets = [0, 16], sizes = [8, 8], strides = [1, 1]} : vector<16x96xf32> to vector<8x8xf32>
    %15 = vector.extract_strided_slice %5 {offsets = [0, 48], sizes = [8, 8], strides = [1, 1]} : vector<16x96xf32> to vector<8x8xf32>
    %16 = vector.extract_strided_slice %5 {offsets = [0, 80], sizes = [8, 8], strides = [1, 1]} : vector<16x96xf32> to vector<8x8xf32>
    %cst_7 = arith.constant dense<0.000000e+00> : vector<8x8xf32>
    %17 = tpu.matmul %14, %15, %cst_7 {dimension_numbers = #tpu.dot_dimension_numbers<[1], [1], [0], [0], [0, 0, 1, 0], [], []>} : vector<8x8xf32>, vector<8x8xf32>, vector<8x8xf32> -> vector<8x8xf32>
    %18 = vector.extract_strided_slice %5 {offsets = [0, 24], sizes = [8, 8], strides = [1, 1]} : vector<16x96xf32> to vector<8x8xf32>
    %19 = vector.extract_strided_slice %5 {offsets = [0, 56], sizes = [8, 8], strides = [1, 1]} : vector<16x96xf32> to vector<8x8xf32>
    %20 = vector.extract_strided_slice %5 {offsets = [0, 88], sizes = [8, 8], strides = [1, 1]} : vector<16x96xf32> to vector<8x8xf32>
    %cst_8 = arith.constant dense<0.000000e+00> : vector<8x8xf32>
    %21 = tpu.matmul %18, %19, %cst_8 {dimension_numbers = #tpu.dot_dimension_numbers<[1], [1], [0], [0], [0, 0, 1, 0], [], []>} : vector<8x8xf32>, vector<8x8xf32>, vector<8x8xf32> -> vector<8x8xf32>
    %22 = vector.extract_strided_slice %5 {offsets = [8, 0], sizes = [8, 8], strides = [1, 1]} : vector<16x96xf32> to vector<8x8xf32>
    %23 = vector.extract_strided_slice %5 {offsets = [8, 32], sizes = [8, 8], strides = [1, 1]} : vector<16x96xf32> to vector<8x8xf32>
    %24 = vector.extract_strided_slice %5 {offsets = [8, 64], sizes = [8, 8], strides = [1, 1]} : vector<16x96xf32> to vector<8x8xf32>
    %cst_9 = arith.constant dense<0.000000e+00> : vector<8x8xf32>
    %25 = tpu.matmul %22, %23, %cst_9 {dimension_numbers = #tpu.dot_dimension_numbers<[1], [1], [0], [0], [0, 0, 1, 0], [], []>} : vector<8x8xf32>, vector<8x8xf32>, vector<8x8xf32> -> vector<8x8xf32>
    %26 = vector.extract_strided_slice %5 {offsets = [8, 8], sizes = [8, 8], strides = [1, 1]} : vector<16x96xf32> to vector<8x8xf32>
    %27 = vector.extract_strided_slice %5 {offsets = [8, 40], sizes = [8, 8], strides = [1, 1]} : vector<16x96xf32> to vector<8x8xf32>
    %28 = vector.extract_strided_slice %5 {offsets = [8, 72], sizes = [8, 8], strides = [1, 1]} : vector<16x96xf32> to vector<8x8xf32>
    %cst_10 = arith.constant dense<0.000000e+00> : vector<8x8xf32>
    %29 = tpu.matmul %26, %27, %cst_10 {dimension_numbers = #tpu.dot_dimension_numbers<[1], [1], [0], [0], [0, 0, 1, 0], [], []>} : vector<8x8xf32>, vector<8x8xf32>, vector<8x8xf32> -> vector<8x8xf32>
    %30 = vector.extract_strided_slice %5 {offsets = [8, 16], sizes = [8, 8], strides = [1, 1]} : vector<16x96xf32> to vector<8x8xf32>
    %31 = vector.extract_strided_slice %5 {offsets = [8, 48], sizes = [8, 8], strides = [1, 1]} : vector<16x96xf32> to vector<8x8xf32>
    %32 = vector.extract_strided_slice %5 {offsets = [8, 80], sizes = [8, 8], strides = [1, 1]} : vector<16x96xf32> to vector<8x8xf32>
    %cst_11 = arith.constant dense<0.000000e+00> : vector<8x8xf32>
    %33 = tpu.matmul %30, %31, %cst_11 {dimension_numbers = #tpu.dot_dimension_numbers<[1], [1], [0], [0], [0, 0, 1, 0], [], []>} : vector<8x8xf32>, vector<8x8xf32>, vector<8x8xf32> -> vector<8x8xf32>
    %34 = vector.extract_strided_slice %5 {offsets = [8, 24], sizes = [8, 8], strides = [1, 1]} : vector<16x96xf32> to vector<8x8xf32>
    %35 = vector.extract_strided_slice %5 {offsets = [8, 56], sizes = [8, 8], strides = [1, 1]} : vector<16x96xf32> to vector<8x8xf32>
    %36 = vector.extract_strided_slice %5 {offsets = [8, 88], sizes = [8, 8], strides = [1, 1]} : vector<16x96xf32> to vector<8x8xf32>
    %cst_12 = arith.constant dense<0.000000e+00> : vector<8x8xf32>
    %37 = tpu.matmul %34, %35, %cst_12 {dimension_numbers = #tpu.dot_dimension_numbers<[1], [1], [0], [0], [0, 0, 1, 0], [], []>} : vector<8x8xf32>, vector<8x8xf32>, vector<8x8xf32> -> vector<8x8xf32>
    %38 = tpu.concatenate %9, %13, %17, %21, %25, %29, %33, %37 in 0 : vector<8x8xf32>, vector<8x8xf32>, vector<8x8xf32>, vector<8x8xf32>, vector<8x8xf32>, vector<8x8xf32>, vector<8x8xf32>, vector<8x8xf32> -> vector<64x8xf32>
    %cst_13 = arith.constant 0.176776692 : f32
    %39 = vector.broadcast %cst_13 : f32 to vector<64x8xf32>
    %40 = arith.mulf %38, %39 : vector<64x8xf32>
    %cst_14 = arith.constant dense<0xFF800000> : vector<64xf32>
    %41 = vector.multi_reduction <maximumf>, %40, %cst_14 [1] : vector<64x8xf32> to vector<64xf32>
    %42 = vector.shape_cast %41 : vector<64xf32> to vector<64x1xf32>
    %43 = vector.broadcast %42 : vector<64x1xf32> to vector<64x8xf32>
    %44 = arith.subf %40, %43 : vector<64x8xf32>
    %45 = math.exp %44 : vector<64x8xf32>
    %cst_15 = arith.constant dense<0.000000e+00> : vector<64xf32>
    %46 = vector.multi_reduction <add>, %45, %cst_15 [1] : vector<64x8xf32> to vector<64xf32>
    %47 = vector.shape_cast %46 : vector<64xf32> to vector<64x1xf32>
    %48 = tpu.reciprocal %47 {approx = true} : vector<64x1xf32> -> vector<64x1xf32>
    %49 = vector.broadcast %48 : vector<64x1xf32> to vector<64x8xf32>
    %50 = arith.mulf %45, %49 : vector<64x8xf32>
    %51 = vector.extract_strided_slice %50 {offsets = [0, 0], sizes = [8, 8], strides = [1, 1]} : vector<64x8xf32> to vector<8x8xf32>
    %cst_16 = arith.constant dense<0.000000e+00> : vector<8x8xf32>
    %52 = tpu.matmul %51, %8, %cst_16 {dimension_numbers = #tpu.dot_dimension_numbers<[1], [0], [0], [1], [0, 0, 1, 1], [], []>} : vector<8x8xf32>, vector<8x8xf32>, vector<8x8xf32> -> vector<8x8xf32>
    %53 = vector.extract_strided_slice %50 {offsets = [8, 0], sizes = [8, 8], strides = [1, 1]} : vector<64x8xf32> to vector<8x8xf32>
    %cst_17 = arith.constant dense<0.000000e+00> : vector<8x8xf32>
    %54 = tpu.matmul %53, %12, %cst_17 {dimension_numbers = #tpu.dot_dimension_numbers<[1], [0], [0], [1], [0, 0, 1, 1], [], []>} : vector<8x8xf32>, vector<8x8xf32>, vector<8x8xf32> -> vector<8x8xf32>
    %55 = vector.extract_strided_slice %50 {offsets = [16, 0], sizes = [8, 8], strides = [1, 1]} : vector<64x8xf32> to vector<8x8xf32>
    %cst_18 = arith.constant dense<0.000000e+00> : vector<8x8xf32>
    %56 = tpu.matmul %55, %16, %cst_18 {dimension_numbers = #tpu.dot_dimension_numbers<[1], [0], [0], [1], [0, 0, 1, 1], [], []>} : vector<8x8xf32>, vector<8x8xf32>, vector<8x8xf32> -> vector<8x8xf32>
    %57 = vector.extract_strided_slice %50 {offsets = [24, 0], sizes = [8, 8], strides = [1, 1]} : vector<64x8xf32> to vector<8x8xf32>
    %cst_19 = arith.constant dense<0.000000e+00> : vector<8x8xf32>
    %58 = tpu.matmul %57, %20, %cst_19 {dimension_numbers = #tpu.dot_dimension_numbers<[1], [0], [0], [1], [0, 0, 1, 1], [], []>} : vector<8x8xf32>, vector<8x8xf32>, vector<8x8xf32> -> vector<8x8xf32>
    %59 = tpu.concatenate %52, %54, %56, %58 in 1 : vector<8x8xf32>, vector<8x8xf32>, vector<8x8xf32>, vector<8x8xf32> -> vector<8x32xf32>
    %60 = vector.extract_strided_slice %50 {offsets = [32, 0], sizes = [8, 8], strides = [1, 1]} : vector<64x8xf32> to vector<8x8xf32>
    %cst_20 = arith.constant dense<0.000000e+00> : vector<8x8xf32>
    %61 = tpu.matmul %60, %24, %cst_20 {dimension_numbers = #tpu.dot_dimension_numbers<[1], [0], [0], [1], [0, 0, 1, 1], [], []>} : vector<8x8xf32>, vector<8x8xf32>, vector<8x8xf32> -> vector<8x8xf32>
    %62 = vector.extract_strided_slice %50 {offsets = [40, 0], sizes = [8, 8], strides = [1, 1]} : vector<64x8xf32> to vector<8x8xf32>
    %cst_21 = arith.constant dense<0.000000e+00> : vector<8x8xf32>
    %63 = tpu.matmul %62, %28, %cst_21 {dimension_numbers = #tpu.dot_dimension_numbers<[1], [0], [0], [1], [0, 0, 1, 1], [], []>} : vector<8x8xf32>, vector<8x8xf32>, vector<8x8xf32> -> vector<8x8xf32>
    %64 = vector.extract_strided_slice %50 {offsets = [48, 0], sizes = [8, 8], strides = [1, 1]} : vector<64x8xf32> to vector<8x8xf32>
    %cst_22 = arith.constant dense<0.000000e+00> : vector<8x8xf32>
    %65 = tpu.matmul %64, %32, %cst_22 {dimension_numbers = #tpu.dot_dimension_numbers<[1], [0], [0], [1], [0, 0, 1, 1], [], []>} : vector<8x8xf32>, vector<8x8xf32>, vector<8x8xf32> -> vector<8x8xf32>
    %66 = vector.extract_strided_slice %50 {offsets = [56, 0], sizes = [8, 8], strides = [1, 1]} : vector<64x8xf32> to vector<8x8xf32>
    %cst_23 = arith.constant dense<0.000000e+00> : vector<8x8xf32>
    %67 = tpu.matmul %66, %36, %cst_23 {dimension_numbers = #tpu.dot_dimension_numbers<[1], [0], [0], [1], [0, 0, 1, 1], [], []>} : vector<8x8xf32>, vector<8x8xf32>, vector<8x8xf32> -> vector<8x8xf32>
    %68 = tpu.concatenate %61, %63, %65, %67 in 1 : vector<8x8xf32>, vector<8x8xf32>, vector<8x8xf32>, vector<8x8xf32> -> vector<8x32xf32>
    %69 = tpu.concatenate %59, %68 in 0 : vector<8x32xf32>, vector<8x32xf32> -> vector<16x32xf32>
    %c0_24 = arith.constant 0 : index
    %c0_25 = arith.constant 0 : index
    %70 = vector.load %arg3[%c0_24, %c0_25] : memref<32x32xf32, #tpu.memory_space<vmem>>, vector<32x32xf32>
    %cst_26 = arith.constant dense<0.000000e+00> : vector<16x32xf32>
    %71 = tpu.matmul %69, %70, %cst_26 {dimension_numbers = #tpu.dot_dimension_numbers<[1], [0], [0], [1], [0, 0, 1, 1], [], []>} : vector<16x32xf32>, vector<32x32xf32>, vector<16x32xf32> -> vector<16x32xf32>
    %c0_27 = arith.constant 0 : index
    %c0_28 = arith.constant 0 : index
    %72 = vector.load %arg4[%c0_27, %c0_28] : memref<1x32xf32, #tpu.memory_space<vmem>>, vector<1x32xf32>
    %73 = vector.broadcast %72 : vector<1x32xf32> to vector<16x32xf32>
    %74 = arith.addf %71, %73 : vector<16x32xf32>
    %c0_29 = arith.constant 0 : index
    %c0_30 = arith.constant 0 : index
    %75 = vector.load %arg5[%c0_29, %c0_30] : memref<16x32xf32, #tpu.memory_space<vmem>>, vector<16x32xf32>
    tpu.vector_store %arg5[%c0_29, %c0_30], %74 {strides = array<i32>} : memref<16x32xf32, #tpu.memory_space<vmem>>, vector<16x32xf32>,
    return
  }
}

</mosaic_0001>

<bundles_post_ra>
// kernel: multihead_forward.1
= control target key start
LH: loop header
LB: loop body
LE: loop exit
PB: predicated region body
PF: predicated region fallthrough
CT: control target
= control target key end

     0   :  { %vm34_vm0 = vcmask 261120   ;;  %s2090_s0 = inlined_call_operand.vmem [shape: f32[16,32], index: 0, kind: input, shape index: {}]   ;;  %s2091_s1 = inlined_call_operand.vmem [shape: f32[32,96], index: 1, kind: input, shape index: {}]   ;;  %s2092_s2 = inlined_call_operand.vmem [shape: f32[1,96], index: 2, kind: input, shape index: {}]   ;;  %s2093_s3 = inlined_call_operand.vmem [shape: f32[32,32], index: 3, kind: input, shape index: {}]   ;;  %s2094_s4 = inlined_call_operand.vmem [shape: f32[1,32], index: 4, kind: input, shape index: {}]   ;;  %s2095_s5 = inlined_call_operand.hbm [shape: f32[16,32], index: 5, kind: output, shape index: {}]  }
   0x1   :  { %v23_v0 = vld [vmem:[%s2091_s1] sm:$0xff]  ;;  %v24_v1 = vld [vmem:[%s2091_s1 + $0x8] sm:$0xff]  ;;  %v25_v2 = vld [vmem:[%s2091_s1 + $0x10] sm:$0xff] }
   0x2   :  { %v1761_v3 = vpack.c.bf16 %v24_v1, %v23_v0  ;;  %v26_v4 = vld [vmem:[%s2091_s1 + $0x18] sm:$0xff]  ;;  %v21_v5 = vld [vmem:[%s2090_s0] sm:$0xff] }
   0x3   :  { %v1765_v6 = vpack.c.bf16 %v26_v4, %v25_v2  ;;  %1667 = vmatprep.mubr.msk.f32.mxu0 %vm34_vm0, %v21_v5 }
   0x4   :  { %10 = vsyncpa [#allocation3], 0  ;;  %1762 = vmatprep.subr.bf16.mxu0 %v1761_v3  ;;  %v22_v7 = vld [vmem:[%s2090_s0 + $0x8] sm:$0xff]  ;;  %v1851_v8 = vmov 0.0   ;;  %vm1852_vm1 = vmmov 0   ;;  %s1853_s0 = smov 96  }
   0x5   :  { %1764 = vmatpush3.bf16.msra.mxu0 %v1761_v3  ;;  %1670 = vmatprep.subr.mxu1 %v1851_v8  ;;  %v1585_v9 = vld [vmem:[%s2092_s2] ss:$0 sm:$0xff]  ;;  %s1854_s6 = smov 120   ;;  %s1855_s7 = smov 88   ;;  %vm119_vm2 = vcmask 64512   ;;  %vm1152_vm3 = vcmask 130048  }
   0x6   :  { %1766 = vmatprep.subr.bf16.mxu0 %v1765_v6  ;;  %1672 = vmatprep.mubr.msk.f32.mxu1 %vm1852_vm1, %v1851_v8  ;;  %s1856_s8 = smov 80   ;;  %s1857_s2 = smov 72   ;;  %vm1154_vm4 = vcmask 195584  }
   0x7   :  { %s1858_s9 = smov 112   ;;  %s1859_s10 = smov 104  }
   0x8   :  { %s1860_s11 = smov 64   ;;  %s1861_s12 = smov 48  }
   0x9   :  { %1768 = vmatpush3.bf16.msra.mxu0 %v1765_v6  ;;  %s1862_s13 = smov 56   ;;  %s1863_s14 = smov 40  }
   0xa   :  { %1690 = vmatprep.subr.mxu0 %v1851_v8  ;;  %s1864_s15 = smov 8   ;;  %s1865_s24 = smov 16  }
   0xb   :  { %s1866_s25 = smov 24   ;;  %s1867_s27 = smov [#allocation2]  }
   0xc   :  { %1668 = vmatmul.mubr.msk.f32.vlgmr.msra.gmra.mrb[0].mxu0 %vm34_vm0, %v22_v7  ;;  %s1574_s28 = sshll.u32 %s1867_s27, 4  ;;  %s1575_s28 = int_to_ptr.vmem [resolvable:$true] %s1574_s28 }
   0xd   :  { %1692 = vmatprep.mubr.msk.f32.mxu0 %vm1852_vm1, %v1851_v8  ;;  %s1827_s29 = scalar_lea.vmem %s1575_s28, 256  ;;  %p1832_p1 = scmp.lt.s32.totalorder %s1575_s28, %s1575_s28 }
   0xe   :  { %p1828_p0 = scmp.ne.s32.totalorder %s1575_s28, %s1827_s29  ;;  %p1833_p2 = scmp.lt.s32.totalorder %s1827_s29, %s1827_s29 }
  0x10   :  { %p1834_p3 = por %p1833_p2, %p1832_p1 }
  0x12   :  { %p1835_p4 = pnand %p1834_p3, %p1828_p0 }
  0xdf   :  { %v1669_v10 = vpop.f32.mrb[0].mxu0 }
  0xe0   :  { %v1928_v11 = vadd.f32 %v1669_v10, %v1585_v9  ;;  %v107_v12 = vpop.f32.mrb[1].mxu0 }
  0xe1   :  { %v1930_v13 = vadd.f32 %v1585_v9, %v107_v12 }
  0xe2   :  { %429 = vrot.lane.b32.xlu1 %v1928_v11, %s1853_s0 }
  0xe3   :  { %117 = vrot.lane.b32.xlu0 %v1930_v13, %s1853_s0 }
  0xe6   :  { %194 = vrot.lane.b32.xlu1 %v1930_v13, %s1854_s6 }
  0xe7   :  { %196 = vrot.lane.b32.xlu0 %v1930_v13, %s1855_s7 }
  0xea   :  { %274 = vrot.lane.b32.xlu1 %v1930_v13, %s1856_s8 }
  0xeb   :  { %507 = vrot.lane.b32.xlu0 %v1928_v11, %s1855_s7 }
  0xee   :  { %352 = vrot.lane.b32.xlu1 %v1930_v13, %s1857_s2 }
  0xef   :  { %272 = vrot.lane.b32.xlu0 %v1930_v13, %s1858_s9 }
  0xf2   :  { %505 = vrot.lane.b32.xlu1 %v1928_v11, %s1854_s6 }
  0xf3   :  { %350 = vrot.lane.b32.xlu0 %v1930_v13, %s1859_s10 }
  0xf6   :  { %663 = vrot.lane.b32.xlu1 %v1928_v11, %s1857_s2 }
  0xf7   :  { %585 = vrot.lane.b32.xlu0 %v1928_v11, %s1856_s8 }
  0xfa   :  { %661 = vrot.lane.b32.xlu1 %v1928_v11, %s1859_s10 }
  0xfb   :  { %583 = vrot.lane.b32.xlu0 %v1928_v11, %s1858_s9 }
 0x154   :  { %v430_v14 = vpop.permute.xlu1 %429 }
 0x155   :  { %1691 = vmatpush3.xpose.msk.msra.mxu0 %vm119_vm2, %v430_v14  ;;  %v118_v15 = vpop.permute.xlu0 %117 }
 0x156   :  { %1671 = vmatpush3.xpose.msk.msra.mxu1 %vm119_vm2, %v118_v15  ;;  %1700 = vmatprep.subr.mxu0 %v1851_v8 }
 0x157   :  { %1675 = vmatprep.subr.mxu1 %v1851_v8 }
 0x158   :  { %1693 = vmatmul.mubr.msk.f32.vlgmr.msra.gmra.mrb[2].mxu0 %vm119_vm2, %v1928_v11  ;;  %v195_v16 = vpop.permute.xlu1 %194 }
 0x159   :  { %1673 = vmatmul.mubr.msk.f32.vlgmr.msra.gmra.mrb[0].mxu1 %vm119_vm2, %v1930_v13  ;;  %v197_v17 = vpop.permute.xlu0 %196  ;;  %1702 = vmatprep.mubr.msk.f32.mxu0 %vm1852_vm1, %v1851_v8 }
 0x15a   :  { %1676 = vmatpush3.xpose.msk.msra.mxu1 %vm119_vm2, %v197_v17  ;;  %1677 = vmatprep.mubr.msk.f32.mxu1 %vm1852_vm1, %v1851_v8 }
 0x15b   :  { %1680 = vmatprep.subr.mxu1 %v1851_v8 }
 0x15c   :  { %v275_v18 = vpop.permute.xlu1 %274 }
 0x15d   :  { %1678 = vmatmul.mubr.msk.f32.vlgmr.msra.gmra.mrb[2].mxu1 %vm119_vm2, %v195_v16  ;;  %v508_v19 = vpop.permute.xlu0 %507 }
 0x15e   :  { %1681 = vmatpush3.xpose.msk.msra.mxu1 %vm119_vm2, %v275_v18  ;;  %1682 = vmatprep.mubr.msk.f32.mxu1 %vm1852_vm1, %v1851_v8 }
 0x15f   :  { %1685 = vmatprep.subr.mxu1 %v1851_v8 }
 0x160   :  { %v353_v20 = vpop.permute.xlu1 %352 }
 0x161   :  { %v273_v21 = vpop.permute.xlu0 %272 }
 0x162   :  { %1683 = vmatmul.mubr.msk.f32.vlgmr.msra.gmra.mrb[4].mxu1 %vm119_vm2, %v273_v21 }
 0x163   :  { %1686 = vmatpush3.xpose.msk.msra.mxu1 %vm119_vm2, %v353_v20  ;;  %1687 = vmatprep.mubr.msk.f32.mxu1 %vm1852_vm1, %v1851_v8 }
 0x164   :  { %v506_v22 = vpop.permute.xlu1 %505  ;;  %1695 = vmatprep.subr.mxu1 %v1851_v8 }
 0x165   :  { %v351_v23 = vpop.permute.xlu0 %350 }
 0x166   :  { %1688 = vmatmul.mubr.msk.f32.vlgmr.msra.gmra.mrb[6].mxu1 %vm119_vm2, %v351_v23 }
 0x167   :  { %1696 = vmatpush3.xpose.msk.msra.mxu1 %vm119_vm2, %v508_v19  ;;  %1697 = vmatprep.mubr.msk.f32.mxu1 %vm1852_vm1, %v1851_v8 }
 0x168   :  { %v664_v24 = vpop.permute.xlu1 %663  ;;  %1705 = vmatprep.subr.mxu1 %v1851_v8 }
 0x169   :  { %v586_v25 = vpop.permute.xlu0 %585 }
 0x16a   :  { %1698 = vmatmul.mubr.msk.f32.vlgmr.msra.gmra.mrb[8].mxu1 %vm119_vm2, %v506_v22  ;;  %1701 = vmatpush3.xpose.msk.msra.mxu0 %vm119_vm2, %v586_v25 }
 0x16b   :  { %1706 = vmatpush3.xpose.msk.msra.mxu1 %vm119_vm2, %v664_v24  ;;  %1707 = vmatprep.mubr.msk.f32.mxu1 %vm1852_vm1, %v1851_v8 }
 0x16c   :  { %v662_v26 = vpop.permute.xlu1 %661  ;;  %1710 = vmatprep.subr.mxu0 %v1851_v8  ;;  %1715 = vmatprep.subr.mxu1 %v1851_v8 }
 0x16d   :  { %v584_v27 = vpop.permute.xlu0 %583 }
 0x16e   :  { %1703 = vmatmul.mubr.msk.f32.vlgmr.msra.gmra.mrb[4].mxu0 %vm119_vm2, %v584_v27  ;;  %1708 = vmatmul.mubr.msk.f32.vlgmr.msra.gmra.mrb[10].mxu1 %vm119_vm2, %v662_v26 }
 0x16f   :  { %1717 = vmatprep.mubr.msk.f32.mxu1 %vm1852_vm1, %v1851_v8  ;;  %1712 = vmatprep.mubr.msk.f32.mxu0 %vm1852_vm1, %v1851_v8 }
 0x22b   :  { %v501_v28 = vpop.f32.mrb[2].mxu0 }
 0x22c   :  { %v190_v29 = vpop.f32.mrb[0].mxu1  ;;  %v1694_v30 = vpop.f32.mrb[3].mxu0  ;;  %v743_v37 = vmul.f32 0.17677669, %v501_v28 }
 0x22d   :  { %v739_v31 = vmul.f32 0.17677669, %v190_v29  ;;  %v1674_v32 = vpop.f32.mrb[1].mxu1 }
 0x22e   :  { %v759_v42 = vsel %vm119_vm2, %v743_v37, -inf }
 0x22f   :  { %v747_v33 = vsel %vm119_vm2, %v739_v31, -inf }
 0x230   :  { %748 = vmax.xlane.f32.xlu0 %v747_v33  ;;  %v268_v34 = vpop.f32.mrb[2].mxu1 }
 0x231   :  { %v740_v35 = vmul.f32 0.17677669, %v268_v34  ;;  %v1679_v36 = vpop.f32.mrb[3].mxu1 }
 0x233   :  { %v750_v38 = vsel %vm119_vm2, %v740_v35, -inf }
 0x234   :  { %751 = vmax.xlane.f32.xlu1 %v750_v38 }
 0x235   :  { %v346_v39 = vpop.f32.mrb[4].mxu1 }
 0x236   :  { %v1990_v40 = vmul.f32 0.17677669, %v346_v39  ;;  %v1684_v41 = vpop.f32.mrb[5].mxu1 }
 0x238   :  { %760 = vmax.xlane.f32.xlu1 %v759_v42  ;;  %v753_v43 = vsel %vm119_vm2, %v1990_v40, -inf }
 0x239   :  { %754 = vmax.xlane.f32.xlu0 %v753_v43  ;;  %v424_v44 = vpop.f32.mrb[6].mxu1 }
 0x23a   :  { %v742_v45 = vmul.f32 0.17677669, %v424_v44  ;;  %v1689_v46 = vpop.f32.mrb[7].mxu1 }
 0x23c   :  { %v756_v47 = vsel %vm119_vm2, %v742_v45, -inf }
 0x23d   :  { %757 = vmax.xlane.f32.xlu0 %v756_v47  ;;  %v579_v48 = vpop.f32.mrb[8].mxu1 }
 0x23e   :  { %v744_v49 = vmul.f32 0.17677669, %v579_v48  ;;  %v1699_v50 = vpop.f32.mrb[9].mxu1 }
 0x240   :  { %v762_v51 = vsel %vm119_vm2, %v744_v49, -inf }
 0x241   :  { %763 = vmax.xlane.f32.xlu0 %v762_v51  ;;  %v657_v52 = vpop.f32.mrb[4].mxu0  ;;  %v735_v53 = vpop.f32.mrb[10].mxu1 }
 0x242   :  { %v745_v54 = vmul.f32 0.17677669, %v657_v52  ;;  %v746_v55 = vmul.f32 0.17677669, %v735_v53  ;;  %v1704_v56 = vpop.f32.mrb[5].mxu0  ;;  %v1709_v57 = vpop.f32.mrb[11].mxu1 }
 0x244   :  { %v768_v58 = vsel %vm119_vm2, %v746_v55, -inf  ;;  %v765_v59 = vsel %vm119_vm2, %v745_v54, -inf }
 0x245   :  { %769 = vmax.xlane.f32.xlu0 %v768_v58  ;;  %766 = vmax.xlane.f32.xlu1 %v765_v59 }
 0x256   :  { %835 = vrot.lane.b32.xlu1 %v1930_v13, %s1860_s11 }
 0x25a   :  { %987 = vrot.lane.b32.xlu1 %v1930_v13, %s1861_s12 }
 0x25b   :  { %911 = vrot.lane.b32.xlu0 %v1930_v13, %s1862_s13 }
 0x25e   :  { %1063 = vrot.lane.b32.xlu1 %v1930_v13, %s1863_s14 }
 0x25f   :  { %1156 = vrot.lane.b32.xlu0 %v1928_v11, %s1860_s11 }
 0x262   :  { %1232 = vrot.lane.b32.xlu1 %v1928_v11, %s1862_s13 }
 0x2bd   :  { %v749_v60 = vpop.xlane.xlu0 %748 }
 0x2be   :  { %v771_v63 = vsub.f32 %v739_v31, %v749_v60 }
 0x2c0   :  { %v779_v4 = vmul.f32 1.442695, %v771_v63 }
 0x2c1   :  { %v752_v61 = vpop.xlane.xlu1 %751 }
 0x2c2   :  { %v772_v62 = vsub.f32 %v740_v35, %v752_v61 }
 0x2c4   :  { %v781_v0 = vmul.f32 1.442695, %v772_v62 }
 0x2c5   :  { %v761_v1 = vpop.xlane.xlu1 %760 }
 0x2c6   :  { %1795 = vpow2.f32 %v781_v0  ;;  %v775_v2 = vsub.f32 %v743_v37, %v761_v1  ;;  %v755_v3 = vpop.xlane.xlu0 %754 }
 0x2c7   :  { %v773_v14 = vsub.f32 %v1990_v40, %v755_v3 }
 0x2c8   :  { %v787_v5 = vmul.f32 1.442695, %v775_v2 }
 0x2c9   :  { %v783_v22 = vmul.f32 1.442695, %v773_v14 }
 0x2ca   :  { %1797 = vpow2.f32 %v787_v5  ;;  %v758_v6 = vpop.xlane.xlu0 %757 }
 0x2cb   :  { %v774_v7 = vsub.f32 %v742_v45, %v758_v6  ;;  %1799 = vpow2.f32 %v779_v4 }
 0x2cd   :  { %v785_v9 = vmul.f32 1.442695, %v774_v7 }
 0x2ce   :  { %v764_v10 = vpop.xlane.xlu0 %763 }
 0x2cf   :  { %1801 = vpow2.f32 %v785_v9  ;;  %v776_v12 = vsub.f32 %v744_v49, %v764_v10 }
 0x2d0   :  { %v1796_v13 = vpop.eup %1795 }
 0x2d1   :  { %v789_v15 = vmul.f32 1.442695, %v776_v12  ;;  %v798_v16 = vsel %vm119_vm2, %v1796_v13, 0.0  ;;  %v1475_v12 = vld [vmem:[%s2093_s3] sm:$0xff] }
 0x2d2   :  { %799 = vadd.xlane.f32.xlu0 %v798_v16  ;;  %v767_v17 = vpop.xlane.xlu1 %766  ;;  %v770_v18 = vpop.xlane.xlu0 %769  ;;  %v1477_v16 = vld [vmem:[%s2093_s3 + $0x10] sm:$0xff] }
 0x2d3   :  { %1803 = vpow2.f32 %v789_v15  ;;  %v777_v19 = vsub.f32 %v745_v54, %v767_v17  ;;  %v778_v20 = vsub.f32 %v746_v55, %v770_v18  ;;  %v1478_v17 = vld [vmem:[%s2093_s3 + $0x18] sm:$0xff] }
 0x2d4   :  { %v2009_v21 = vpop.eup %1797 }
 0x2d5   :  { %v791_v23 = vmul.f32 1.442695, %v777_v19  ;;  %v793_v24 = vmul.f32 1.442695, %v778_v20  ;;  %v807_v25 = vsel %vm119_vm2, %v2009_v21, 0.0  ;;  %v1800_v26 = vpop.eup %1799  ;;  %v1773_v19 = vpack.c.bf16 %v1478_v17, %v1477_v16 }
 0x2d6   :  { %808 = vadd.xlane.f32.xlu1 %v807_v25  ;;  %v836_v27 = vpop.permute.xlu1 %835  ;;  %v912_v28 = vpop.permute.xlu0 %911  ;;  %v795_v30 = vsel %vm119_vm2, %v1800_v26, 0.0 }
 0x2d7   :  { %1805 = vpow2.f32 %v791_v23  ;;  %1711 = vmatpush3.msra.mxu0 %v836_v27  ;;  %1716 = vmatpush3.msra.mxu1 %v912_v28 }
 0x2d8   :  { %1807 = vpow2.f32 %v793_v24  ;;  %1725 = vmatprep.subr.mxu1 %v1851_v8  ;;  %1720 = vmatprep.subr.mxu0 %v1851_v8 }
 0x2d9   :  { %v1802_v29 = vpop.eup %1801  ;;  %1809 = vpow2.f32 %v783_v22 }
 0x2da   :  { %796 = vadd.xlane.f32.xlu1 %v795_v30  ;;  %v804_v31 = vsel %vm119_vm2, %v1802_v29, 0.0  ;;  %v988_v40 = vpop.permute.xlu1 %987  ;;  %v1157_v42 = vpop.permute.xlu0 %1156 }
 0x2db   :  { %805 = vadd.xlane.f32.xlu0 %v804_v31 }
 0x2dd   :  { %v1804_v32 = vpop.eup %1803 }
 0x2de   :  { %v810_v33 = vsel %vm119_vm2, %v1804_v32, 0.0  ;;  %v1064_v41 = vpop.permute.xlu1 %1063 }
 0x2df   :  { %811 = vadd.xlane.f32.xlu0 %v810_v33 }
 0x2e1   :  { %v2018_v34 = vpop.eup %1805 }
 0x2e2   :  { %v1808_v35 = vpop.eup %1807  ;;  %v813_v36 = vsel %vm119_vm2, %v2018_v34, 0.0  ;;  %v1233_v43 = vpop.permute.xlu1 %1232 }
 0x2e3   :  { %v1810_v37 = vpop.eup %1809  ;;  %814 = vadd.xlane.f32.xlu1 %v813_v36  ;;  %v816_v38 = vsel %vm119_vm2, %v1808_v35, 0.0 }
 0x2e4   :  { %817 = vadd.xlane.f32.xlu0 %v816_v38  ;;  %v801_v39 = vsel %vm119_vm2, %v1810_v37, 0.0 }
 0x2e7   :  { %802 = vadd.xlane.f32.xlu1 %v801_v39 }
 0x2f8   :  { %1384 = vrot.lane.b32.xlu1 %v1928_v11, %s1863_s14 }
 0x2fa   :  { %1308 = vrot.lane.b32.xlu0 %v1928_v11, %s1861_s12 }
 0x35f   :  { %v800_v44 = vpop.xlane.xlu0 %799 }
 0x360   :  { %1811 = vrcp.f32 %v800_v44 }
 0x363   :  { %v809_v45 = vpop.xlane.xlu1 %808 }
 0x367   :  { %v797_v46 = vpop.xlane.xlu1 %796 }
 0x368   :  { %1813 = vrcp.f32 %v797_v46  ;;  %v806_v47 = vpop.xlane.xlu0 %805 }
 0x369   :  { %1815 = vrcp.f32 %v806_v47 }
 0x36a   :  { %v1812_v48 = vpop.eup %1811 }
 0x36b   :  { %v828_v49 = vmul.f32 %v1812_v48, %v1796_v13 }
 0x36c   :  { %v812_v50 = vpop.xlane.xlu0 %811 }
 0x36d   :  { %1817 = vrcp.f32 %v812_v50  ;;  %1718 = vmatmul.mubr.msk.f32.vlgmr.msra.gmra.mrb[12].mxu1 %vm119_vm2, %v828_v49 }
 0x36e   :  { %1726 = vmatpush3.msra.mxu1 %v1064_v41  ;;  %1727 = vmatprep.mubr.msk.f32.mxu1 %vm1852_vm1, %v1851_v8 }
 0x36f   :  { %1735 = vmatprep.subr.mxu1 %v1851_v8 }
 0x370   :  { %v815_v11 = vpop.xlane.xlu1 %814 }
 0x371   :  { %v818_v51 = vpop.xlane.xlu0 %817 }
 0x372   :  { %v1814_v52 = vpop.eup %1813  ;;  %1819 = vrcp.f32 %v818_v51 }
 0x373   :  { %v1816_v53 = vpop.eup %1815  ;;  %v827_v54 = vmul.f32 %v1814_v52, %v1800_v26 }
 0x374   :  { %v830_v55 = vmul.f32 %v1816_v53, %v1802_v29  ;;  %v803_v56 = vpop.xlane.xlu1 %802 }
 0x375   :  { %1821 = vrcp.f32 %v803_v56  ;;  %1713 = vmatmul.mubr.msk.f32.vlgmr.msra.gmra.mrb[6].mxu0 %vm119_vm2, %v827_v54  ;;  %v1309_v3 = vpop.permute.xlu0 %1308 }
 0x376   :  { %1721 = vmatpush3.msra.mxu0 %v988_v40  ;;  %1728 = vmatmul.mubr.msk.f32.vlgmr.msra.gmra.mrb[14].mxu1 %vm119_vm2, %v830_v55  ;;  %1823 = vrcp.f32 %v809_v45  ;;  %v1612_v40 = vld [vmem:[%s2094_s4] ss:$0 sm:$0xff] }
 0x377   :  { %v1818_v57 = vpop.eup %1817  ;;  %1736 = vmatpush3.msra.mxu1 %v1233_v43  ;;  %1737 = vmatprep.mubr.msk.f32.mxu1 %vm1852_vm1, %v1851_v8  ;;  %1825 = vrcp.f32 %v815_v11 }
 0x378   :  { %v832_v58 = vmul.f32 %v1818_v57, %v1804_v32  ;;  %v1385_v59 = vpop.permute.xlu1 %1384  ;;  %1745 = vmatprep.subr.mxu1 %v1851_v8  ;;  %1722 = vmatprep.mubr.msk.f32.mxu0 %vm1852_vm1, %v1851_v8 }
 0x379   :  { %1730 = vmatprep.subr.mxu0 %v1851_v8 }
 0x37a   :  { %1738 = vmatmul.mubr.msk.f32.vlgmr.msra.gmra.mrb[16].mxu1 %vm119_vm2, %v832_v58 }
 0x37b   :  { %1746 = vmatpush3.msra.mxu1 %v1385_v59  ;;  %1747 = vmatprep.mubr.msk.f32.mxu1 %vm1852_vm1, %v1851_v8 }
 0x37c   :  { %v1820_v60 = vpop.eup %1819 }
 0x37d   :  { %v834_v61 = vmul.f32 %v1820_v60, %v1808_v35 }
 0x37f   :  { %v1822_v62 = vpop.eup %1821  ;;  %1748 = vmatmul.mubr.msk.f32.vlgmr.msra.gmra.mrb[18].mxu1 %vm119_vm2, %v834_v61 }
 0x380   :  { %v829_v63 = vmul.f32 %v1822_v62, %v1810_v37  ;;  %v1824_v0 = vpop.eup %1823 }
 0x381   :  { %v831_v1 = vmul.f32 %v1824_v0, %v2009_v21  ;;  %v1826_v2 = vpop.eup %1825 }
 0x382   :  { %1723 = vmatmul.mubr.msk.f32.vlgmr.msra.gmra.mrb[8].mxu0 %vm119_vm2, %v829_v63  ;;  %v833_v4 = vmul.f32 %v1826_v2, %v2018_v34 }
 0x383   :  { %1731 = vmatpush3.msra.mxu0 %v1157_v42  ;;  %1732 = vmatprep.mubr.msk.f32.mxu0 %vm1852_vm1, %v1851_v8 }
 0x384   :  { %1740 = vmatprep.subr.mxu0 %v1851_v8 }
 0x386   :  { %1733 = vmatmul.mubr.msk.f32.vlgmr.msra.gmra.mrb[10].mxu0 %vm119_vm2, %v831_v1 }
 0x387   :  { %1741 = vmatpush3.msra.mxu0 %v1309_v3  ;;  %1742 = vmatprep.mubr.msk.f32.mxu0 %vm1852_vm1, %v1851_v8  ;;  %v1476_v8 = vld [vmem:[%s2093_s3 + $0x8] sm:$0xff] }
 0x388   :  { %v1769_v14 = vpack.c.bf16 %v1476_v8, %v1475_v12 }
 0x38a   :  { %1743 = vmatmul.mubr.msk.f32.vlgmr.msra.gmra.mrb[12].mxu0 %vm119_vm2, %v833_v4  ;;  %1770 = vmatprep.subr.bf16.mxu0 %v1769_v14 }
 0x38b   :  { %1772 = vmatpush3.bf16.msra.mxu0 %v1769_v14 }
 0x38c   :  { %1774 = vmatprep.subr.bf16.mxu0 %v1773_v19 }
 0x38f   :  { %1776 = vmatpush3.bf16.msra.mxu0 %v1773_v19 }
 0x440   :  { %v983_v5 = vpop.f32.mrb[12].mxu1 }
 0x441   :  { %1140 = vrot.lane.b32.xlu0 %v983_v5, %s1864_s15  ;;  %v1719_v6 = vpop.f32.mrb[13].mxu1 }
 0x448   :  { %v907_v7 = vpop.f32.mrb[6].mxu0 }
 0x449   :  { %v1714_v9 = vpop.f32.mrb[7].mxu0  ;;  %v1135_v10 = vpop.f32.mrb[14].mxu1 }
 0x44a   :  { %v1729_v13 = vpop.f32.mrb[15].mxu1 }
 0x44d   :  { %v1304_v15 = vpop.f32.mrb[16].mxu1 }
 0x44e   :  { %1461 = vrot.lane.b32.xlu0 %v1304_v15, %s1864_s15  ;;  %v1739_v18 = vpop.f32.mrb[17].mxu1 }
 0x452   :  { %v1456_v20 = vpop.f32.mrb[18].mxu1 }
 0x453   :  { %v1749_v21 = vpop.f32.mrb[19].mxu1 }
 0x455   :  { %v1059_v22 = vpop.f32.mrb[8].mxu0 }
 0x456   :  { %1144 = vrot.lane.b32.xlu1 %v1059_v22, %s1865_s24  ;;  %v1724_v23 = vpop.f32.mrb[9].mxu0 }
 0x459   :  { %v1228_v24 = vpop.f32.mrb[10].mxu0 }
 0x45a   :  { %v1734_v25 = vpop.f32.mrb[11].mxu0  ;;  %1148 = vrot.lane.b32.xlu1 %v1135_v10, %s1866_s25 }
 0x45d   :  { %v1380_v26 = vpop.f32.mrb[12].mxu0 }
 0x45e   :  { %1469 = vrot.lane.b32.xlu1 %v1456_v20, %s1866_s25  ;;  %1465 = vrot.lane.b32.xlu0 %v1380_v26, %s1865_s24  ;;  %v1744_v27 = vpop.f32.mrb[13].mxu0 }
 0x4b3   :  { %v1141_v28 = vpop.permute.xlu0 %1140 }
 0x4b4   :  { %v1151_v30 = vsel %vm119_vm2, %v907_v7, %v1141_v28 }
 0x4c0   :  { %v1462_v31 = vpop.permute.xlu0 %1461 }
 0x4c1   :  { %v1472_v35 = vsel %vm119_vm2, %v1228_v24, %v1462_v31 }
 0x4c8   :  { %v1145_v29 = vpop.permute.xlu1 %1144 }
 0x4c9   :  { %v1153_v32 = vsel %vm1152_vm3, %v1151_v30, %v1145_v29 }
 0x4cc   :  { %v1149_v33 = vpop.permute.xlu1 %1148 }
 0x4cd   :  { %v1155_v34 = vsel %vm1154_vm4, %v1153_v32, %v1149_v33 }
 0x4ce   :  { %1758 = vmatprep.mubr.msk.f32.mxu0 %vm34_vm0, %v1155_v34 }
 0x4d0   :  { %v1470_v36 = vpop.permute.xlu1 %1469  ;;  %v1466_v37 = vpop.permute.xlu0 %1465 }
 0x4d1   :  { %v1473_v38 = vsel %vm1152_vm3, %v1472_v35, %v1466_v37 }
 0x4d2   :  { %v1474_v39 = vsel %vm1154_vm4, %v1473_v38, %v1470_v36 }
 0x4d3   :  { %1759 = vmatmul.mubr.msk.f32.vlgmr.msra.gmra.mrb[14].mxu0 %vm34_vm0, %v1474_v39 }
 0x5a6   :  { %v1760_v41 = vpop.f32.mrb[14].mxu0 }
 0x5a7   :  { %v1564_v42 = vadd.f32 %v1760_v41, %v1612_v40  ;;  %v1558_v43 = vpop.f32.mrb[15].mxu0 }
 0x5a8   :  { %v1559_v44 = vadd.f32 %v1612_v40, %v1558_v43 }
 0x5a9   :  { %1568 = vst.msk [vmem:[#allocation2 + $0x8] sm:$0xff] %vm34_vm0, %v1564_v42 }
 0x5aa   :  { %1567 = vst.msk [vmem:[#allocation2] sm:$0xff] %vm34_vm0, %v1559_v44 }
 0x5ab   :  { %1838 = shalt.err (!%p1835_p4)
}
 0x5ac   :  { %s1839_s30 = scalar_lea.hbm %s2095_s5, 256 }
 0x5ad   :  { %p1840_p5 = scmp.ne.s32.totalorder %s2095_s5, %s1839_s30  ;;  %p1843_p6 = scmp.lt.u32.totalorder %s1839_s30, %s2095_s5 }
 0x5af   :  { %p1845_p7 = pnand %p1843_p6, %p1840_p5 }
 0x5b1   :  { %1848 = shalt.err (!%p1845_p7)
}
 0x5b2   :  { %s1868_s2 = smov 128  }
 0x5b3   :  { %1580 = dma.vmem_to_hbm [thread:$0]  %s1575_s28, 256, %s2095_s5, [#allocation3], %s1868_s2, %s1868_s2, %s1864_s15  }
 0x5b4   :  { %1849 = dma.done.wait [#allocation3], 256  }
 0x5b5   :  { %1850 = vsyncadd [#allocation3], 4294967040 }
 0x5b6   :  { %1584 = vsyncpa [#allocation3], 1 }

</bundles_post_ra>
